<compile_context>
chip_gen: v7x
topology: tpu7x:2x2x1
jax: 0.10.0
libtpu: 0.0.40
codegen_flags: <defaults>
</compile_context>

<pallas_src>
import functools
import math

import jax
import jax.numpy as jnp
from jax.experimental import pallas as pl
from jax.experimental.pallas import tpu as pltpu

LOG_STD_MAX = 2.0
LOG_STD_MIN = -20.0
_HALF_LOG_2PI = 0.5 * math.log(2.0 * math.pi)
_LOG2 = math.log(2.0)


def _softplus(x):
    # numerically stable softplus: log(1 + exp(x))
    return jnp.maximum(x, 0.0) + jnp.log1p(jnp.exp(-jnp.abs(x)))


def actor_kernel(state_ref,
                 w1_ref, b1_ref,
                 w2_ref, b2_ref,
                 wh_ref, bh_ref,
                 *rest,
                 deterministic, with_logprob, action_dim, apad):
    # unpack flag-dependent trailing refs: [noise_ref?], a_ref, [logp_ref?]
    idx = 0
    noise_ref = None
    if not deterministic:
        noise_ref = rest[idx]
        idx += 1
    a_ref = rest[idx]
    idx += 1
    logp_ref = rest[idx] if with_logprob else None

    def mm(w_ref, x, b_ref):
        # (out, in) @ (in, Bt) + (out, 1)  -> (out, Bt); f32 MXU accumulate
        return jnp.dot(w_ref[...], x, preferred_element_type=jnp.float32) + b_ref[...]

    x = state_ref[...]                                    # (S, Bt)

    # a_net: Linear -> ReLU -> Linear -> ReLU (hidden AND output activation are ReLU)
    h = jnp.maximum(mm(w1_ref, x, b1_ref), 0.0)           # (H1, Bt)
    h = jnp.maximum(mm(w2_ref, h, b2_ref), 0.0)           # (H2, Bt)

    # fused heads: rows [0, A) = mu, rows [apad, apad+A) = log_std (sublane-aligned split)
    head = mm(wh_ref, h, bh_ref)                          # (apad + A, Bt)
    mu = head[:action_dim]
    log_std = jnp.clip(head[apad:apad + action_dim], LOG_STD_MIN, LOG_STD_MAX)
    std = jnp.exp(log_std)

    # u = mu (deterministic)  or  mu + std * eps (rsample, eps supplied from host)
    if deterministic:
        u = mu
    else:
        eps = noise_ref[...]                              # (A, Bt)
        u = mu + std * eps

    # squashed action -- lane-dense (A, Bt) store
    a_ref[...] = jnp.tanh(u)

    if with_logprob:
        # Normal(mu, std).log_prob(u) with z = (u - mu)/std simplified:
        #   stochastic:    z == eps  ->  -0.5*eps^2 - log_std - 0.5*log(2*pi)
        #   deterministic: z == 0    ->            - log_std - 0.5*log(2*pi)
        if deterministic:
            normal_logp = -log_std - _HALF_LOG_2PI
        else:
            normal_logp = -0.5 * eps * eps - log_std - _HALF_LOG_2PI
        # tanh correction: 2*(log2 - u - softplus(-2u))
        tanh_corr = 2.0 * (_LOG2 - u - _softplus(-2.0 * u))
        # reduce over the (small) action sublane axis -> (1, Bt) lane-dense store
        logp_ref[...] = jnp.sum(normal_logp - tanh_corr, axis=0, keepdims=True)


def _pick_block_b(batch, target=2048):
    """Lane-axis (batch) tile: full batch for small inputs, else a multiple of 128
    sized so the grid has >= 2 steps (keeps both v7x TCs busy) and caps at `target`
    (VMEM-safe on v7x's 64 MiB)."""
    if batch <= 256:
        return batch
    half = (batch + 1) // 2
    blk = -(-half // 128) * 128
    return min(max(blk, 128), target)


def actor_forward_t(params, state_t, noise_t=None, *, action_dim,
                    deterministic=False, with_logprob=True, block_b=None):
    """Transposed (feature-major) Actor forward.

    state_t: (state_dim, batch); noise_t: (action_dim, batch) standard-normal eps
    (required when deterministic=False).  Returns (a_t, logp) with shapes
    (action_dim, batch) and (1, batch) (logp is None when with_logprob=False).
    """
    state_dim, batch = state_t.shape
    apad = -(-action_dim // 8) * 8

    if not deterministic:
        if noise_t is None:
            raise ValueError("stochastic path needs standard-normal noise (eps) of "
                             f"shape ({action_dim}, {batch})")

    if block_b is None:
        block_b = _pick_block_b(batch)
    grid = (pl.cdiv(batch, block_b),)      # ragged tail handled by Pallas masking; no host pad

    w1, b1 = params["w1"], params["b1"]
    w2, b2 = params["w2"], params["b2"]
    wh, bh = params["w_head"], params["b_head"]

    inputs = [state_t, w1, b1, w2, b2, wh, bh]
    in_specs = [
        pl.BlockSpec((state_dim, block_b), lambda i: (0, i)),   # streamed state tile
        pl.BlockSpec(w1.shape, lambda i: (0, 0)),               # weights: grid-invariant
        pl.BlockSpec(b1.shape, lambda i: (0, 0)),
        pl.BlockSpec(w2.shape, lambda i: (0, 0)),
        pl.BlockSpec(b2.shape, lambda i: (0, 0)),
        pl.BlockSpec(wh.shape, lambda i: (0, 0)),
        pl.BlockSpec(bh.shape, lambda i: (0, 0)),
    ]
    if not deterministic:
        inputs.append(noise_t)
        in_specs.append(pl.BlockSpec((action_dim, block_b), lambda i: (0, i)))

    out_specs = [pl.BlockSpec((action_dim, block_b), lambda i: (0, i))]
    out_shape = [jax.ShapeDtypeStruct((action_dim, batch), jnp.float32)]
    if with_logprob:
        out_specs.append(pl.BlockSpec((1, block_b), lambda i: (0, i)))   # lane-dense logp
        out_shape.append(jax.ShapeDtypeStruct((1, batch), jnp.float32))

    # advisory cost estimate so XLA overlaps this small call with surrounding ops
    h1 = w1.shape[0]
    h2 = w2.shape[0]
    hr = wh.shape[0]
    flops = 2 * batch * (state_dim * h1 + h1 * h2 + h2 * hr) + 12 * batch * action_dim
    transcendentals = batch * action_dim * (5 if with_logprob else 2)
    bytes_accessed = 4 * (batch * (state_dim
                                   + (0 if deterministic else action_dim)
                                   + action_dim
                                   + (1 if with_logprob else 0))
                          + w1.size + b1.size + w2.size + b2.size + wh.size + bh.size)

    outs = pl.pallas_call(
        functools.partial(actor_kernel,
                          deterministic=deterministic,
                          with_logprob=with_logprob,
                          action_dim=action_dim,
                          apad=apad),
        grid=grid,
        in_specs=in_specs,
        out_specs=out_specs,
        out_shape=out_shape,
        compiler_params=pltpu.CompilerParams(
            dimension_semantics=("parallel",)),
        cost_estimate=pl.CostEstimate(flops=flops,
                                      transcendentals=transcendentals,
                                      bytes_accessed=bytes_accessed),
    )(*inputs)

    a_t = outs[0]
    logp = outs[1] if with_logprob else None
    return a_t, logp


def actor_forward(params, state, noise=None, *, action_dim,
                  deterministic=False, with_logprob=True, block_b=None):
    """Row-major convenience wrapper matching the PyTorch Actor API:
    state (batch, state_dim) -> a (batch, action_dim), logp (batch, 1).
    Pure layout plumbing around the transposed kernel; prefer actor_forward_t
    when the caller can keep data feature-major."""
    state_t = state.T
    noise_t = None if noise is None else noise.T
    a_t, logp_t = actor_forward_t(params, state_t, noise_t, action_dim=action_dim,
                                  deterministic=deterministic,
                                  with_logprob=with_logprob, block_b=block_b)
    a = a_t.T
    logp = None if logp_t is None else logp_t.T
    return a, logp


def _init_linear(key, fan_in, fan_out):
    """torch.nn.Linear-style init, stored (out, in) / (out, 1) for the transposed layout."""
    kw, kb = jax.random.split(key)
    bound = 1.0 / math.sqrt(fan_in)
    w = jax.random.uniform(kw, (fan_out, fan_in), jnp.float32, -bound, bound)
    b = jax.random.uniform(kb, (fan_out, 1), jnp.float32, -bound, bound)
    return w, b


def make_actor_params(key, state_dim, action_dim, hid_shape):
    h1, h2 = hid_shape
    k1, k2, k3, k4 = jax.random.split(key, 4)
    w1, b1 = _init_linear(k1, state_dim, h1)
    w2, b2 = _init_linear(k2, h1, h2)
    w_mu, b_mu = _init_linear(k3, h2, action_dim)
    w_ls, b_ls = _init_linear(k4, h2, action_dim)
    # fused head, sublane-aligned: rows [0,A)=mu, zero-pad to 8-row boundary,
    # rows [apad, apad+A)=log_std -> both in-kernel slices are tile-aligned.
    apad = -(-action_dim // 8) * 8
    pad_rows = apad - action_dim
    if pad_rows:
        zw = jnp.zeros((pad_rows, h2), jnp.float32)
        zb = jnp.zeros((pad_rows, 1), jnp.float32)
        w_head = jnp.concatenate([w_mu, zw, w_ls], axis=0)
        b_head = jnp.concatenate([b_mu, zb, b_ls], axis=0)
    else:
        w_head = jnp.concatenate([w_mu, w_ls], axis=0)
        b_head = jnp.concatenate([b_mu, b_ls], axis=0)
    return dict(w1=w1, b1=b1, w2=w2, b2=b2, w_head=w_head, b_head=b_head)


def actor_reference(params, state_t, noise_t, deterministic, with_logprob, action_dim):
    """Pure-JAX reference (transposed layout) mirroring the PyTorch Actor.forward."""
    apad = -(-action_dim // 8) * 8
    h = jnp.maximum(params["w1"] @ state_t + params["b1"], 0.0)
    h = jnp.maximum(params["w2"] @ h + params["b2"], 0.0)
    head = params["w_head"] @ h + params["b_head"]
    mu = head[:action_dim]
    log_std = jnp.clip(head[apad:apad + action_dim], LOG_STD_MIN, LOG_STD_MAX)
    std = jnp.exp(log_std)
    u = mu if deterministic else mu + std * noise_t
    a = jnp.tanh(u)
    if not with_logprob:
        return a, None
    z = jnp.zeros_like(u) if deterministic else noise_t
    normal_logp = -0.5 * z * z - log_std - _HALF_LOG_2PI
    corr = 2.0 * (_LOG2 - u - jax.nn.softplus(-2.0 * u))
    logp = jnp.sum(normal_logp - corr, axis=0, keepdims=True)
    return a, logp


if __name__ == "__main__":
    state_dim = 16
    action_dim = 4
    hid_shape = (32, 32)
    batch = 8

    root = jax.random.PRNGKey(0)
    k_params, k_state, k_noise = jax.random.split(root, 3)

    params = make_actor_params(k_params, state_dim, action_dim, hid_shape)
    # batch-on-lanes layout: (features, batch)
    state_t = jax.random.normal(k_state, (state_dim, batch), jnp.float32)
    noise_t = jax.random.normal(k_noise, (action_dim, batch), jnp.float32)  # eps for rsample

    # stochastic path (rsample with explicit eps) + log-prob
    a, logp = actor_forward_t(params, state_t, noise_t, action_dim=action_dim,
                              deterministic=False, with_logprob=True)
    jax.block_until_ready(a)
    jax.block_until_ready(logp)
    assert a.shape == (action_dim, batch) and logp.shape == (1, batch)
    a_ref, logp_ref = actor_reference(params, state_t, noise_t, False, True, action_dim)
    assert jnp.allclose(a, a_ref, rtol=5e-2, atol=5e-2)
    assert jnp.allclose(logp, logp_ref, rtol=5e-2, atol=5e-2)

    # deterministic path (u = mu), no log-prob: noise operand and logp work fully skipped
    a_det, logp_none = actor_forward_t(params, state_t, action_dim=action_dim,
                                       deterministic=True, with_logprob=False)
    jax.block_until_ready(a_det)
    assert logp_none is None and a_det.shape == (action_dim, batch)
    a_det_ref, _ = actor_reference(params, state_t, None, True, False, action_dim)
    assert jnp.allclose(a_det, a_det_ref, rtol=5e-2, atol=5e-2)

    # deterministic path with log-prob (exercises the z == 0 specialization)
    a_d2, logp_d2 = actor_forward_t(params, state_t, action_dim=action_dim,
                                    deterministic=True, with_logprob=True)
    jax.block_until_ready(logp_d2)
    _, logp_d2_ref = actor_reference(params, state_t, None, True, True, action_dim)
    assert logp_d2.shape == (1, batch)
    assert jnp.allclose(logp_d2, logp_d2_ref, rtol=5e-2, atol=5e-2)

    # row-major convenience wrapper (API parity with the PyTorch module)
    a_rm, logp_rm = actor_forward(params, state_t.T, noise_t.T, action_dim=action_dim,
                                  deterministic=False, with_logprob=True)
    jax.block_until_ready(a_rm)
    assert a_rm.shape == (batch, action_dim) and logp_rm.shape == (batch, 1)

    print("KERNEL_OK")
</pallas_src>

<mosaic_0001>
module attributes {stable_mosaic.version = 11 : i64} {
  func.func @actor_kernel(%arg0: i32, %arg1: memref<16x8xf32, #tpu.memory_space<vmem>>, %arg2: memref<32x16xf32, #tpu.memory_space<vmem>>, %arg3: memref<32x1xf32, #tpu.memory_space<vmem>>, %arg4: memref<32x32xf32, #tpu.memory_space<vmem>>, %arg5: memref<32x1xf32, #tpu.memory_space<vmem>>, %arg6: memref<12x32xf32, #tpu.memory_space<vmem>>, %arg7: memref<12x1xf32, #tpu.memory_space<vmem>>, %arg8: memref<4x8xf32, #tpu.memory_space<vmem>>, %arg9: memref<4x8xf32, #tpu.memory_space<vmem>>, %arg10: memref<1x8xf32, #tpu.memory_space<vmem>>) attributes {dimension_semantics = [#tpu.dimension_semantics<parallel>], iteration_bounds = array<i64: 1>, scalar_prefetch = 0 : i64, scratch_operands = 0 : i64, tpu.core_type = #tpu.core_type<tc>, window_params = [{transform_indices = @transform_0, window_bounds = array<i64: 16, 8>}, {pipeline_mode = #tpu.pipeline_mode<synchronous>, transform_indices = @transform_1, window_bounds = array<i64: 32, 16>}, {pipeline_mode = #tpu.pipeline_mode<synchronous>, transform_indices = @transform_2, window_bounds = array<i64: 32, 1>}, {pipeline_mode = #tpu.pipeline_mode<synchronous>, transform_indices = @transform_3, window_bounds = array<i64: 32, 32>}, {pipeline_mode = #tpu.pipeline_mode<synchronous>, transform_indices = @transform_4, window_bounds = array<i64: 32, 1>}, {pipeline_mode = #tpu.pipeline_mode<synchronous>, transform_indices = @transform_5, window_bounds = array<i64: 12, 32>}, {pipeline_mode = #tpu.pipeline_mode<synchronous>, transform_indices = @transform_6, window_bounds = array<i64: 12, 1>}, {transform_indices = @transform_7, window_bounds = array<i64: 4, 8>}, {transform_indices = @transform_8, window_bounds = array<i64: 4, 8>}, {transform_indices = @transform_9, window_bounds = array<i64: 1, 8>}]} {
    %c0 = arith.constant 0 : index
    %c0_0 = arith.constant 0 : index
    %0 = vector.load %arg1[%c0, %c0_0] : memref<16x8xf32, #tpu.memory_space<vmem>>, vector<16x8xf32>
    %c0_1 = arith.constant 0 : index
    %c0_2 = arith.constant 0 : index
    %1 = vector.load %arg2[%c0_1, %c0_2] : memref<32x16xf32, #tpu.memory_space<vmem>>, vector<32x16xf32>
    %cst = arith.constant dense<0.000000e+00> : vector<32x8xf32>
    %2 = tpu.matmul %1, %0, %cst {dimension_numbers = #tpu.dot_dimension_numbers<[1], [0], [0], [1], [0, 0, 1, 1], [], []>} : vector<32x16xf32>, vector<16x8xf32>, vector<32x8xf32> -> vector<32x8xf32>
    %c0_3 = arith.constant 0 : index
    %c0_4 = arith.constant 0 : index
    %3 = vector.load %arg3[%c0_3, %c0_4] : memref<32x1xf32, #tpu.memory_space<vmem>>, vector<32x1xf32>
    %4 = vector.broadcast %3 : vector<32x1xf32> to vector<32x8xf32>
    %5 = arith.addf %2, %4 : vector<32x8xf32>
    %cst_5 = arith.constant 0.000000e+00 : f32
    %6 = vector.broadcast %cst_5 : f32 to vector<32x8xf32>
    %7 = arith.maximumf %5, %6 : vector<32x8xf32>
    %c0_6 = arith.constant 0 : index
    %c0_7 = arith.constant 0 : index
    %8 = vector.load %arg4[%c0_6, %c0_7] : memref<32x32xf32, #tpu.memory_space<vmem>>, vector<32x32xf32>
    %cst_8 = arith.constant dense<0.000000e+00> : vector<32x8xf32>
    %9 = tpu.matmul %8, %7, %cst_8 {dimension_numbers = #tpu.dot_dimension_numbers<[1], [0], [0], [1], [0, 0, 1, 1], [], []>} : vector<32x32xf32>, vector<32x8xf32>, vector<32x8xf32> -> vector<32x8xf32>
    %c0_9 = arith.constant 0 : index
    %c0_10 = arith.constant 0 : index
    %10 = vector.load %arg5[%c0_9, %c0_10] : memref<32x1xf32, #tpu.memory_space<vmem>>, vector<32x1xf32>
    %11 = vector.broadcast %10 : vector<32x1xf32> to vector<32x8xf32>
    %12 = arith.addf %9, %11 : vector<32x8xf32>
    %cst_11 = arith.constant 0.000000e+00 : f32
    %13 = vector.broadcast %cst_11 : f32 to vector<32x8xf32>
    %14 = arith.maximumf %12, %13 : vector<32x8xf32>
    %c0_12 = arith.constant 0 : index
    %c0_13 = arith.constant 0 : index
    %15 = vector.load %arg6[%c0_12, %c0_13] : memref<12x32xf32, #tpu.memory_space<vmem>>, vector<12x32xf32>
    %cst_14 = arith.constant dense<0.000000e+00> : vector<12x8xf32>
    %16 = tpu.matmul %15, %14, %cst_14 {dimension_numbers = #tpu.dot_dimension_numbers<[1], [0], [0], [1], [0, 0, 1, 1], [], []>} : vector<12x32xf32>, vector<32x8xf32>, vector<12x8xf32> -> vector<12x8xf32>
    %c0_15 = arith.constant 0 : index
    %c0_16 = arith.constant 0 : index
    %17 = vector.load %arg7[%c0_15, %c0_16] : memref<12x1xf32, #tpu.memory_space<vmem>>, vector<12x1xf32>
    %18 = vector.broadcast %17 : vector<12x1xf32> to vector<12x8xf32>
    %19 = arith.addf %16, %18 : vector<12x8xf32>
    %20 = vector.extract_strided_slice %19 {offsets = [0, 0], sizes = [4, 8], strides = [1, 1]} : vector<12x8xf32> to vector<4x8xf32>
    %21 = vector.extract_strided_slice %19 {offsets = [8, 0], sizes = [4, 8], strides = [1, 1]} : vector<12x8xf32> to vector<4x8xf32>
    %cst_17 = arith.constant -2.000000e+01 : f32
    %cst_18 = arith.constant 2.000000e+00 : f32
    %22 = vector.broadcast %cst_17 : f32 to vector<4x8xf32>
    %23 = arith.maximumf %22, %21 : vector<4x8xf32>
    %24 = vector.broadcast %cst_18 : f32 to vector<4x8xf32>
    %25 = arith.minimumf %24, %23 : vector<4x8xf32>
    %26 = math.exp %25 : vector<4x8xf32>
    %c0_19 = arith.constant 0 : index
    %c0_20 = arith.constant 0 : index
    %27 = vector.load %arg8[%c0_19, %c0_20] : memref<4x8xf32, #tpu.memory_space<vmem>>, vector<4x8xf32>
    %28 = arith.mulf %26, %27 : vector<4x8xf32>
    %29 = arith.addf %20, %28 : vector<4x8xf32>
    %30 = math.tanh %29 : vector<4x8xf32>
    %c0_21 = arith.constant 0 : index
    %c0_22 = arith.constant 0 : index
    %31 = vector.load %arg9[%c0_21, %c0_22] : memref<4x8xf32, #tpu.memory_space<vmem>>, vector<4x8xf32>
    tpu.vector_store %arg9[%c0_21, %c0_22], %30 {strides = array<i32>} : memref<4x8xf32, #tpu.memory_space<vmem>>, vector<4x8xf32>,
    %cst_23 = arith.constant -5.000000e-01 : f32
    %32 = vector.broadcast %cst_23 : f32 to vector<4x8xf32>
    %33 = arith.mulf %32, %27 : vector<4x8xf32>
    %34 = arith.mulf %33, %27 : vector<4x8xf32>
    %35 = arith.subf %34, %25 : vector<4x8xf32>
    %cst_24 = arith.constant 0.918938517 : f32
    %36 = vector.broadcast %cst_24 : f32 to vector<4x8xf32>
    %37 = arith.subf %35, %36 : vector<4x8xf32>
    %cst_25 = arith.constant 0.693147182 : f32
    %38 = vector.broadcast %cst_25 : f32 to vector<4x8xf32>
    %39 = arith.subf %38, %29 : vector<4x8xf32>
    %cst_26 = arith.constant -2.000000e+00 : f32
    %40 = vector.broadcast %cst_26 : f32 to vector<4x8xf32>
    %41 = arith.mulf %40, %29 : vector<4x8xf32>
    %cst_27 = arith.constant 0.000000e+00 : f32
    %42 = vector.broadcast %cst_27 : f32 to vector<4x8xf32>
    %43 = arith.maximumf %41, %42 : vector<4x8xf32>
    %44 = math.absf %41 : vector<4x8xf32>
    %cst_28 = arith.constant 0.000000e+00 : f32
    %45 = vector.broadcast %cst_28 : f32 to vector<4x8xf32>
    %46 = arith.subf %45, %44 : vector<4x8xf32>
    %47 = math.exp %46 : vector<4x8xf32>
    %48 = math.log1p %47 : vector<4x8xf32>
    %49 = arith.addf %43, %48 : vector<4x8xf32>
    %50 = arith.subf %39, %49 : vector<4x8xf32>
    %cst_29 = arith.constant 2.000000e+00 : f32
    %51 = vector.broadcast %cst_29 : f32 to vector<4x8xf32>
    %52 = arith.mulf %51, %50 : vector<4x8xf32>
    %53 = arith.subf %37, %52 : vector<4x8xf32>
    %cst_30 = arith.constant dense<0.000000e+00> : vector<8xf32>
    %54 = vector.multi_reduction <add>, %53, %cst_30 [0] : vector<4x8xf32> to vector<8xf32>
    %55 = vector.shape_cast %54 : vector<8xf32> to vector<1x8xf32>
    %c0_31 = arith.constant 0 : index
    %c0_32 = arith.constant 0 : index
    %56 = vector.load %arg10[%c0_31, %c0_32] : memref<1x8xf32, #tpu.memory_space<vmem>>, vector<1x8xf32>
    tpu.vector_store %arg10[%c0_31, %c0_32], %55 {strides = array<i32>} : memref<1x8xf32, #tpu.memory_space<vmem>>, vector<1x8xf32>,
    return
  }
  func.func @transform_0(%arg0: i32) -> (i32, i32) {
    %c0_i32 = arith.constant 0 : i32
    %c0_i32_0 = arith.constant 0 : i32
    return %c0_i32, %arg0 : i32, i32
  }
  func.func @transform_1(%arg0: i32) -> (i32, i32) {
    %c0_i32 = arith.constant 0 : i32
    %c0_i32_0 = arith.constant 0 : i32
    %c0_i32_1 = arith.constant 0 : i32
    return %c0_i32, %c0_i32_0 : i32, i32
  }
  func.func @transform_2(%arg0: i32) -> (i32, i32) {
    %c0_i32 = arith.constant 0 : i32
    %c0_i32_0 = arith.constant 0 : i32
    %c0_i32_1 = arith.constant 0 : i32
    return %c0_i32, %c0_i32_0 : i32, i32
  }
  func.func @transform_3(%arg0: i32) -> (i32, i32) {
    %c0_i32 = arith.constant 0 : i32
    %c0_i32_0 = arith.constant 0 : i32
    %c0_i32_1 = arith.constant 0 : i32
    return %c0_i32, %c0_i32_0 : i32, i32
  }
  func.func @transform_4(%arg0: i32) -> (i32, i32) {
    %c0_i32 = arith.constant 0 : i32
    %c0_i32_0 = arith.constant 0 : i32
    %c0_i32_1 = arith.constant 0 : i32
    return %c0_i32, %c0_i32_0 : i32, i32
  }
  func.func @transform_5(%arg0: i32) -> (i32, i32) {
    %c0_i32 = arith.constant 0 : i32
    %c0_i32_0 = arith.constant 0 : i32
    %c0_i32_1 = arith.constant 0 : i32
    return %c0_i32, %c0_i32_0 : i32, i32
  }
  func.func @transform_6(%arg0: i32) -> (i32, i32) {
    %c0_i32 = arith.constant 0 : i32
    %c0_i32_0 = arith.constant 0 : i32
    %c0_i32_1 = arith.constant 0 : i32
    return %c0_i32, %c0_i32_0 : i32, i32
  }
  func.func @transform_7(%arg0: i32) -> (i32, i32) {
    %c0_i32 = arith.constant 0 : i32
    %c0_i32_0 = arith.constant 0 : i32
    return %c0_i32, %arg0 : i32, i32
  }
  func.func @transform_8(%arg0: i32) -> (i32, i32) {
    %c0_i32 = arith.constant 0 : i32
    %c0_i32_0 = arith.constant 0 : i32
    return %c0_i32, %arg0 : i32, i32
  }
  func.func @transform_9(%arg0: i32) -> (i32, i32) {
    %c0_i32 = arith.constant 0 : i32
    %c0_i32_0 = arith.constant 0 : i32
    return %c0_i32, %arg0 : i32, i32
  }
}

</mosaic_0001>

<bundles_post_ra>
// kernel: tpu_custom_call.1
= control target key start
LH: loop header
LB: loop body
LE: loop exit
PB: predicated region body
PF: predicated region fallthrough
CT: control target
= control target key end

     0   :  { %15 = vsyncpa [#allocation3], 0  ;;  %vm63_vm0 = vcmask 130048   ;;  %v608_v4 = vmov 0   ;;  %s766_s0 = inlined_call_operand.vmem [shape: f32[16,8], index: 0, kind: input, shape index: {}]   ;;  %s767_s1 = inlined_call_operand.vmem [shape: f32[32,16], index: 1, kind: input, shape index: {}]   ;;  %s768_s2 = inlined_call_operand.vmem [shape: f32[32,1], index: 2, kind: input, shape index: {}]   ;;  %s769_s3 = inlined_call_operand.vmem [shape: f32[32,32], index: 3, kind: input, shape index: {}]   ;;  %s770_s4 = inlined_call_operand.vmem [shape: f32[32,1], index: 4, kind: input, shape index: {}]   ;;  %s771_s5 = inlined_call_operand.vmem [shape: f32[12,32], index: 5, kind: input, shape index: {}]   ;;  %s772_s6 = inlined_call_operand.vmem [shape: f32[12,1], index: 6, kind: input, shape index: {}]   ;;  %s773_s7 = inlined_call_operand.vmem [shape: f32[4,8], index: 7, kind: input, shape index: {}]   ;;  %s774_s8 = inlined_call_operand.hbm [shape: f32[4,8], index: 8, kind: output, shape index: {0}]   ;;  %s775_s9 = inlined_call_operand.hbm [shape: f32[1,8], index: 9, kind: output, shape index: {1}]  }
   0x1   :  { %v33_v0 = vld [vmem:[%s766_s0] sm:$0xff]  ;;  %v34_v1 = vld [vmem:[%s766_s0 + $0x8] sm:$0xff]  ;;  %550 = vset.pattern.permute.xlu0 %v608_v4  ;;  %551 = vset.pattern.permute.xlu1 %v608_v4  ;;  %v41_v6 = vld [vmem:[%s768_s2 + $0x10] sm:$0xff] }
   0x2   :  { %v35_v2 = vld [vmem:[%s767_s1] sm:$0xff]  ;;  %v527_v3 = vpack.c.bf16 %v34_v1, %v33_v0  ;;  %v36_v7 = vld [vmem:[%s767_s1 + $0x8] sm:$0xff]  ;;  %55 = vperm.xlu1 %551, %v41_v6   ;;  %v37_v9 = vld [vmem:[%s767_s1 + $0x10] sm:$0xff] }
   0x3   :  { %496 = vmatprep.mubr.msk.f32.mxu0 %vm63_vm0, %v35_v2  ;;  %v39_v5 = vld [vmem:[%s768_s2] sm:$0xff]  ;;  %v40_v8 = vld [vmem:[%s768_s2 + $0x8] sm:$0xff]  ;;  %v42_v10 = vld [vmem:[%s768_s2 + $0x18] sm:$0xff] }
   0x4   :  { %528 = vmatprep.subr.bf16.mxu0 %v527_v3  ;;  %45 = vperm.xlu0 %550, %v39_v5  }
   0x5   :  { %530 = vmatpush3.bf16.msra.mxu0 %v527_v3 }
   0x6   :  { %16 = vsyncpa [#allocation5], 0  ;;  %v38_v11 = vld [vmem:[%s767_s1 + $0x18] sm:$0xff]  ;;  %60 = vperm.xlu1 %551, %v42_v10   ;;  %v169_v12 = vld [vmem:[%s770_s4] sm:$0xff]  ;;  %vm193_vm1 = vcmask 261120   ;;  %vm398_vm2 = vcmask 60416  }
   0x7   :  { %v170_v13 = vld [vmem:[%s770_s4 + $0x8] sm:$0xff]  ;;  %v171_v14 = vld [vmem:[%s770_s4 + $0x10] sm:$0xff]  ;;  %v172_v15 = vld [vmem:[%s770_s4 + $0x18] sm:$0xff] }
   0x8   :  { %497 = vmatmul.mubr.msk.f32.vlgmr.msra.gmra.mrb[0].mxu0 %vm63_vm0, %v36_v7  ;;  %50 = vperm.xlu0 %550, %v40_v8   ;;  %v298_v16 = vld [vmem:[%s772_s6 + $0x8] sm:$0xf]  ;;  %v297_v17 = vld [vmem:[%s772_s6] sm:$0xff]  ;;  %v167_v38 = vld [vmem:[%s769_s3 + $0x10] sm:$0xff] }
   0x9   :  { %499 = vmatprep.mubr.msk.f32.mxu0 %vm63_vm0, %v37_v9  ;;  %v165_v18 = vld [vmem:[%s769_s3] sm:$0xff]  ;;  %v166_v37 = vld [vmem:[%s769_s3 + $0x8] sm:$0xff]  ;;  %v168_v39 = vld [vmem:[%s769_s3 + $0x18] sm:$0xff] }
   0xa   :  { %180 = vperm.xlu1 %551, %v170_v13   ;;  %510 = vmatprep.mubr.msk.f32.mxu1 %vm193_vm1, %v165_v18  ;;  %v295_v40 = vld [vmem:[%s771_s5] sm:$0xff]  ;;  %v296_v59 = vld [vmem:[%s771_s5 + $0x8] sm:$0xf]  ;;  %s609_s5 = smov [#allocation2]  }
   0xb   :  { %v394_v5 = vld [vmem:[%s773_s7] sm:$0xf]  ;;  %s439_s27 = sshll.u32 %s609_s5, 4  ;;  %s440_s27 = int_to_ptr.vmem [resolvable:$true] %s439_s27 }
   0xc   :  { %500 = vmatmul.mubr.msk.f32.gmra.mrb[2].mxu0 %vm63_vm0, %v38_v11  ;;  %175 = vperm.xlu0 %550, %v169_v12   ;;  %s560_s28 = scalar_lea.vmem %s440_s27, 64  ;;  %p565_p1 = scmp.lt.s32.totalorder %s440_s27, %s440_s27 }
   0xd   :  { %524 = vmatprep.mubr.msk.f32.mxu0 %vm193_vm1, %v295_v40  ;;  %p561_p0 = scmp.ne.s32.totalorder %s440_s27, %s560_s28  ;;  %p566_p2 = scmp.lt.s32.totalorder %s560_s28, %s560_s28 }
   0xe   :  { %190 = vperm.xlu1 %551, %v172_v15  }
   0xf   :  { %p567_p3 = por %p566_p2, %p565_p1 }
  0x10   :  { %185 = vperm.xlu0 %550, %v171_v14  }
  0x11   :  { %p568_p4 = pnand %p567_p3, %p561_p0 }
  0x12   :  { %301 = vperm.xlu1 %551, %v297_v17  }
  0x14   :  { %306 = vperm.xlu0 %550, %v298_v16  }
  0x81   :  { %v56_v20 = vpop.permute.xlu1 %55 }
  0x83   :  { %v46_v19 = vpop.permute.xlu0 %45 }
  0x85   :  { %v61_v27 = vpop.permute.xlu1 %60 }
  0x87   :  { %v51_v21 = vpop.permute.xlu0 %50 }
  0x89   :  { %v181_v41 = vpop.permute.xlu1 %180 }
  0x8b   :  { %v176_v42 = vpop.permute.xlu0 %175 }
  0x8d   :  { %v191_v48 = vpop.permute.xlu1 %190 }
  0x8f   :  { %v186_v51 = vpop.permute.xlu0 %185 }
  0x91   :  { %v302_v4 = vpop.permute.xlu1 %301 }
  0x93   :  { %v307_v60 = vpop.permute.xlu0 %306 }
  0xdb   :  { %v498_v22 = vpop.f32.mrb[0].mxu0 }
  0xdc   :  { %v148_v23 = vadd.f32 %v498_v22, %v51_v21  ;;  %v142_v24 = vpop.f32.mrb[1].mxu0 }
  0xdd   :  { %v143_v25 = vadd.f32 %v142_v24, %v46_v19 }
  0xde   :  { %v162_v26 = vmax.f32 %v148_v23, 0.0 }
  0xdf   :  { %v161_v28 = vmax.f32 %v143_v25, 0.0  ;;  %v501_v29 = vpop.f32.mrb[2].mxu0 }
  0xe0   :  { %v158_v30 = vadd.f32 %v501_v29, %v61_v27  ;;  %v152_v31 = vpop.f32.mrb[3].mxu0 }
  0xe1   :  { %v153_v32 = vadd.f32 %v152_v31, %v56_v20  ;;  %v531_v33 = vpack.c.bf16 %v162_v26, %v161_v28 }
  0xe2   :  { %v164_v34 = vmax.f32 %v158_v30, 0.0 }
  0xe3   :  { %v163_v35 = vmax.f32 %v153_v32, 0.0  ;;  %532 = vmatprep.subr.bf16.mxu1 %v531_v33 }
  0xe4   :  { %534 = vmatpush3.bf16.msra.mxu1 %v531_v33 }
  0xe5   :  { %v535_v36 = vpack.c.bf16 %v164_v34, %v163_v35 }
  0xe7   :  { %536 = vmatprep.subr.bf16.mxu1 %v535_v36 }
  0xe8   :  { %538 = vmatpush3.bf16.msra.mxu1 %v535_v36 }
  0xeb   :  { %511 = vmatmul.mubr.msk.f32.vlgmr.msra.gmra.mrb[0].mxu1 %vm193_vm1, %v166_v37 }
  0xec   :  { %513 = vmatprep.mubr.msk.f32.mxu1 %vm193_vm1, %v167_v38 }
  0xef   :  { %514 = vmatmul.mubr.msk.f32.gmra.mrb[2].mxu1 %vm193_vm1, %v168_v39 }
 0x1be   :  { %v512_v43 = vpop.f32.mrb[0].mxu1 }
 0x1bf   :  { %v278_v44 = vadd.f32 %v512_v43, %v181_v41  ;;  %v272_v45 = vpop.f32.mrb[1].mxu1 }
 0x1c0   :  { %v273_v46 = vadd.f32 %v272_v45, %v176_v42 }
 0x1c1   :  { %v292_v47 = vmax.f32 %v278_v44, 0.0 }
 0x1c2   :  { %v291_v49 = vmax.f32 %v273_v46, 0.0  ;;  %v515_v50 = vpop.f32.mrb[2].mxu1 }
 0x1c3   :  { %v288_v52 = vadd.f32 %v515_v50, %v191_v48  ;;  %v282_v53 = vpop.f32.mrb[3].mxu1 }
 0x1c4   :  { %v539_v54 = vpack.c.bf16 %v292_v47, %v291_v49  ;;  %v283_v55 = vadd.f32 %v282_v53, %v186_v51 }
 0x1c5   :  { %v294_v56 = vmax.f32 %v288_v52, 0.0 }
 0x1c6   :  { %v293_v57 = vmax.f32 %v283_v55, 0.0  ;;  %540 = vmatprep.subr.bf16.mxu0 %v539_v54 }
 0x1c7   :  { %542 = vmatpush3.bf16.msra.mxu0 %v539_v54 }
 0x1c8   :  { %v543_v58 = vpack.c.bf16 %v294_v56, %v293_v57 }
 0x1ca   :  { %544 = vmatprep.subr.bf16.mxu0 %v543_v58 }
 0x1cb   :  { %546 = vmatpush3.bf16.msra.mxu0 %v543_v58 }
 0x1ce   :  { %525 = vmatmul.mubr.msk.f32.vlgmr.msra.gmra.mrb[4].mxu0 %vm193_vm1, %v296_v59 }
 0x2a1   :  { %v526_v61 = vpop.f32.mrb[4].mxu0 }
 0x2a2   :  { %v387_v62 = vadd.f32 %v526_v61, %v307_v60  ;;  %v381_v63 = vpop.f32.mrb[5].mxu0 }
 0x2a3   :  { %v382_v6 = vadd.f32 %v381_v63, %v302_v4 }
 0x2a4   :  { %v390_v0 = vmax.f32 %v387_v62, -20.0 }
 0x2a6   :  { %v391_v1 = vmin.f32 %v390_v0, 2.0 }
 0x2a8   :  { %v392_v2 = vmul.f32 1.442695, %v391_v1 }
 0x2aa   :  { %552 = vpow2.f32 %v392_v2 }
 0x2b4   :  { %v553_v3 = vpop.eup %552 }
 0x2b5   :  { %v395_v7 = vmul.f32 %v553_v3, %v394_v5 }
 0x2b7   :  { %v396_v8 = vadd.f32 %v395_v7, %v382_v6 }
 0x2b9   :  { %554 = vtanh.f32 %v396_v8  ;;  %v405_v9 = vmul.f32 -2.0, %v396_v8 }
 0x2bb   :  { %v407_v10 = vand.u32 2147483647, %v405_v9 }
 0x2bd   :  { %v408_v11 = vsub.f32 0.0, %v407_v10 }
 0x2bf   :  { %v409_v12 = vmul.f32 1.442695, %v408_v11 }
 0x2c1   :  { %556 = vpow2.f32 %v409_v12 }
 0x2c3   :  { %v555_v13 = vpop.eup %554 }
 0x2c4   :  { %399 = vst.msk [vmem:[#allocation2] sm:$0xf] %vm398_vm2, %v555_v13 }
 0x2c5   :  { %571 = shalt.err (!%p568_p4)
}
 0x2c6   :  { %s572_s30 = scalar_lea.hbm %s774_s8, 64 }
 0x2c7   :  { %p573_p5 = scmp.ne.s32.totalorder %s774_s8, %s572_s30  ;;  %p576_p6 = scmp.lt.u32.totalorder %s572_s30, %s774_s8 }
 0x2c9   :  { %p578_p7 = pnand %p576_p6, %p573_p5 }
 0x2cb   :  { %581 = shalt.err (!%p578_p7)
}
 0x2cc   :  { %442 = dma.vmem_to_hbm [thread:$0]  %s440_s27, 64, %s774_s8, [#allocation3]   ;;  %v557_v14 = vpop.eup %556  ;;  %v400_v17 = vmul.f32 -0.5, %v394_v5  ;;  %v406_v24 = vmax.f32 %v405_v9, 0.0  ;;  %v404_v27 = vsub.f32 0.6931472, %v396_v8 }
 0x2cd   :  { %v411_v15 = vadd.f32 1.0, %v557_v14  ;;  %v414_v16 = vmul.f32 -0.5, %v557_v14  ;;  %v417_v19 = vand.u32 2147483647, %v557_v14  ;;  %s610_s8 = smov [#allocation4]   ;;  %vm431_vm4 = vcmask 57344  }
 0x2ce   :  { %v401_v21 = vmul.f32 %v400_v17, %v394_v5  ;;  %s449_s14 = sshll.u32 %s610_s8, 4  ;;  %s450_s14 = int_to_ptr.vmem [resolvable:$true] %s449_s14 }
 0x2cf   :  { %558 = vlog2.f32 %v411_v15  ;;  %v415_v18 = vadd.f32 1.0, %v414_v16  ;;  %vm418_vm3 = vcmp.lt.f32.partialorder %v417_v19, 0.0004427343  ;;  %s582_s15 = scalar_lea.vmem %s450_s14, 16  ;;  %s586_s16 = scalar_lea.vmem %s450_s14, 32 }
 0x2d0   :  { %v402_v26 = vsub.f32 %v401_v21, %v391_v1  ;;  %p583_p8 = scmp.ne.s32.totalorder %s450_s14, %s582_s15  ;;  %p587_p9 = scmp.lt.s32.totalorder %s450_s14, %s450_s14 }
 0x2d1   :  { %v416_v23 = vmul.f32 %v557_v14, %v415_v18  ;;  %p588_p10 = scmp.lt.s32.totalorder %s586_s16, %s582_s15 }
 0x2d2   :  { %v471_v30 = vadd.f32 -0.9189385, %v402_v26 }
 0x2d3   :  { %p589_p11 = por %p588_p10, %p587_p9 }
 0x2d5   :  { %p590_p12 = pnand %p589_p11, %p583_p8 }
 0x2d9   :  { %v559_v20 = vpop.eup %558 }
 0x2da   :  { %v413_v22 = vmul.f32 0.6931472, %v559_v20 }
 0x2dc   :  { %v419_v25 = vsel %vm418_vm3, %v416_v23, %v413_v22 }
 0x2dd   :  { %v420_v28 = vadd.f32 %v419_v25, %v406_v24 }
 0x2df   :  { %v421_v29 = vsub.f32 %v404_v27, %v420_v28 }
 0x2e1   :  { %v422_v31 = vmul.f32 2.0, %v421_v29 }
 0x2e3   :  { %v423_v32 = vsub.f32 %v471_v30, %v422_v31 }
 0x2e5   :  { %v424_v33 = vsel %vm398_vm2, %v423_v32, 0.0 }
 0x2e6   :  { %v425_v34 = vrot.slane %v424_v33, 4 }
 0x2e8   :  { %v426_v35 = vadd.f32 %v425_v34, %v424_v33 }
 0x2ea   :  { %v427_v36 = vrot.slane %v426_v35, 2 }
 0x2ec   :  { %v428_v37 = vadd.f32 %v427_v36, %v426_v35 }
 0x2ee   :  { %v429_v38 = vrot.slane %v428_v37, 1 }
 0x2f0   :  { %v430_v39 = vadd.f32 %v429_v38, %v428_v37 }
 0x2f2   :  { %432 = vst.msk [vmem:[#allocation4] sm:$0x1] %vm431_vm4, %v430_v39 }
 0x2f3   :  { %593 = shalt.err (!%p590_p12)
}
 0x2f4   :  { %s594_s4 = scalar_lea.hbm %s775_s9, 16 }
 0x2f5   :  { %p595_p13 = scmp.ne.s32.totalorder %s775_s9, %s594_s4  ;;  %p598_p0 = scmp.lt.u32.totalorder %s594_s4, %s775_s9 }
 0x2f7   :  { %p600_p1 = pnand %p598_p0, %p595_p13 }
 0x2f9   :  { %603 = shalt.err (!%p600_p1)
}
 0x2fa   :  { %452 = dma.vmem_to_hbm [thread:$0]  %s450_s14, 16, %s775_s9, [#allocation5]  }
 0x2fb   :  { %604 = dma.done.wait [#allocation3], 64  }
 0x2fc   :  { %605 = vsyncadd [#allocation3], 4294967232 }
 0x2fd   :  { %606 = dma.done.wait [#allocation5], 16  }
 0x2fe   :  { %607 = vsyncadd [#allocation5], 4294967280 }
 0x2ff   :  { %459 = vsyncpa [#allocation3], 1 }
 0x300   :  { %460 = vsyncpa [#allocation5], 1 }

</bundles_post_ra>
